<compile_context>
chip_gen: v7x
topology: tpu7x:2x2x1
jax: 0.10.0
libtpu: 0.0.40
codegen_flags: <defaults>
</compile_context>

<pallas_src>
import jax
import jax.numpy as jnp
from jax.experimental import pallas as pl
from jax.experimental.pallas import tpu as pltpu

LANE = 128
SUBLANE = 8


def _round_up(x, m):
    return ((x + m - 1) // m) * m


# ---------------------------------------------------------------------------
# Kernels
# ---------------------------------------------------------------------------
def _node_kernel(x_ref, rrwp_ref, wn_ref, o_ref):
    # x_out = x + rrwp @ W_node    (fc_node has no bias)
    o_ref[...] = x_ref[...] + jnp.dot(
        rrwp_ref[...], wn_ref[...], preferred_element_type=jnp.float32
    )


def _edge_kernel(val_ref, we_ref, o_ref):
    # out_val = [rrwp_val | count] @ [W_edge ; dummy_emb]
    # (dummy-edge term folded into the contraction — pure MXU + dense store)
    o_ref[...] = jnp.dot(
        val_ref[...], we_ref[...], preferred_element_type=jnp.float32
    )


# ---------------------------------------------------------------------------
# Wrappers
# ---------------------------------------------------------------------------
def node_encode(x, rrwp, w_node, *, row_tile=256):
    """x: [N, D] f32, rrwp: [N, K] f32, w_node: [K, D] f32 -> [N, D] f32."""
    N, D = x.shape
    K = rrwp.shape[1]
    Dp = _round_up(D, LANE)                       # lane-dense output
    row_tile = min(row_tile, _round_up(N, SUBLANE))
    Np = _round_up(N, row_tile)

    x_p = jnp.pad(x, ((0, Np - N), (0, Dp - D)))
    rrwp_p = jnp.pad(rrwp, ((0, Np - N), (0, 0)))
    w_p = jnp.pad(w_node, ((0, 0), (0, Dp - D)))

    out = pl.pallas_call(
        _node_kernel,
        out_shape=jax.ShapeDtypeStruct((Np, Dp), jnp.float32),
        grid_spec=pltpu.PrefetchScalarGridSpec(
            num_scalar_prefetch=0,
            grid=(Np // row_tile,),
            in_specs=[
                pl.BlockSpec((row_tile, Dp), lambda i: (i, 0)),
                pl.BlockSpec((row_tile, K), lambda i: (i, 0)),
                pl.BlockSpec((K, Dp), lambda i: (0, 0)),   # weights resident
            ],
            out_specs=pl.BlockSpec((row_tile, Dp), lambda i: (i, 0)),
        ),
        compiler_params=pltpu.CompilerParams(
            dimension_semantics=("parallel",),
            vmem_limit_bytes=64 << 20,
        ),
    )(x_p, rrwp_p, w_p)
    return out[:N, :D]


def edge_encode(rrwp_val, w_edge, edge_count, dummy_emb, *, row_tile=1024,
                use_bf16_inputs=False):
    """rrwp_val: [P, K], w_edge: [K, D], edge_count: [P, 1], dummy_emb: [1, D].

    Returns [P, D] f32 = rrwp_val @ w_edge + edge_count * dummy_emb.
    """
    P, K = rrwp_val.shape
    D = w_edge.shape[1]
    Dp = _round_up(D, LANE)                       # lane-dense output

    # Fold count * dummy_emb into the matmul: one extra contraction column/row.
    val_aug = jnp.concatenate([rrwp_val, edge_count], axis=1)          # [P, K+1]
    w_aug = jnp.concatenate(
        [jnp.pad(w_edge, ((0, 0), (0, Dp - D))),
         jnp.pad(dummy_emb, ((0, 0), (0, Dp - D)))],
        axis=0,                                                         # [K+1, Dp]
    )
    Kp1 = K + 1

    row_tile = min(row_tile, _round_up(P, SUBLANE))
    Pp = _round_up(P, row_tile)
    if Pp != P:
        val_aug = jnp.pad(val_aug, ((0, Pp - P), (0, 0)))

    if use_bf16_inputs:
        # Halves HBM read traffic on v6e/v7x; accumulation stays f32 on the MXU.
        val_aug = val_aug.astype(jnp.bfloat16)
        w_aug = w_aug.astype(jnp.bfloat16)

    out = pl.pallas_call(
        _edge_kernel,
        out_shape=jax.ShapeDtypeStruct((Pp, Dp), jnp.float32),
        grid_spec=pltpu.PrefetchScalarGridSpec(
            num_scalar_prefetch=0,
            grid=(Pp // row_tile,),
            in_specs=[
                pl.BlockSpec((row_tile, Kp1), lambda i: (i, 0)),
                pl.BlockSpec((Kp1, Dp), lambda i: (0, 0)),  # weights resident
            ],
            out_specs=pl.BlockSpec((row_tile, Dp), lambda i: (i, 0)),
        ),
        compiler_params=pltpu.CompilerParams(
            dimension_semantics=("parallel",),
            vmem_limit_bytes=64 << 20,
        ),
    )(val_aug, w_aug)
    return out[:P, :D]


def weighted_rrwp_linear_encoder(x, rrwp, rrwp_val, edge_index, w_node, w_edge,
                                 dummy_emb, num_nodes, *, edge_row_tile=1024):
    """Full forward (single graph, full-graph padding).

    Returns (x_out [N, D], out_idx [2, N*N], out_val [N*N, D]).
    """
    N = num_nodes

    # ---- node branch (Pallas) -------------------------------------------
    x_out = node_encode(x, rrwp, w_node)

    # ---- edge branch -----------------------------------------------------
    # Dense count of real edges at each (src, dst) pair — index glue in JAX.
    flat = edge_index[0] * N + edge_index[1]
    edge_count = jnp.zeros((N * N,), jnp.float32).at[flat].add(1.0)
    edge_count = edge_count.reshape(N * N, 1)

    out_val = edge_encode(rrwp_val, w_edge, edge_count, dummy_emb,
                          row_tile=edge_row_tile)

    # Coalesced full-graph index: all (i, j) pairs, row-major like coalesce's sort.
    src = jnp.repeat(jnp.arange(N, dtype=jnp.int32), N)
    dst = jnp.tile(jnp.arange(N, dtype=jnp.int32), N)
    out_idx = jnp.stack([src, dst], axis=0)

    return x_out, out_idx, out_val


# ---------------------------------------------------------------------------
# Parameter init (deterministic, mirrors the module's __init__ shapes)
# ---------------------------------------------------------------------------
def init_params(key, walk_length, emb_dim):
    k1, k2, k3 = jax.random.split(key, 3)
    # xavier_uniform for nn.Linear(walk_length, emb_dim, bias=False):
    # weight shape (emb_dim, walk_length); we store it transposed [K, D].
    bound = (6.0 / (walk_length + emb_dim)) ** 0.5
    w_node = jax.random.uniform(k1, (walk_length, emb_dim), jnp.float32, -bound, bound)
    w_edge = jax.random.uniform(k2, (walk_length, emb_dim), jnp.float32, -bound, bound)
    # nn.Embedding(1, emb_dim) default init ~ N(0, 1)
    dummy_emb = jax.random.normal(k3, (1, emb_dim), jnp.float32)
    return w_node, w_edge, dummy_emb


# ---------------------------------------------------------------------------
# Main
# ---------------------------------------------------------------------------
if __name__ == "__main__":
    key = jax.random.PRNGKey(0)
    N = 12           # num nodes (N*N = 144, NOT a multiple of the old 32 tile)
    K = 8            # walk_length (cfg.posenc_RRWP.ksteps)
    D = 32           # emb_dim (< 128 -> exercises lane-padding path)
    E = 16           # number of real (directed) edges

    kx, kr, krv, ke, kp = jax.random.split(key, 5)
    x = jax.random.normal(kx, (N, D), jnp.float32)               # node attrs (already D-dim)
    rrwp = jax.random.uniform(kr, (N, K), jnp.float32)           # diagonal RRWP per node
    rrwp_val = jax.random.uniform(krv, (N * N, K), jnp.float32)  # dense all-pairs RRWP
    edge_index = jax.random.randint(ke, (2, E), 0, N, jnp.int32)

    w_node, w_edge, dummy_emb = init_params(kp, K, D)

    # Small edge_row_tile here to exercise the multi-tile + row-padding path
    # at toy sizes; production default is 1024 (sweep 512-2048 per chip).
    x_out, out_idx, out_val = weighted_rrwp_linear_encoder(
        x, rrwp, rrwp_val, edge_index, w_node, w_edge, dummy_emb, N,
        edge_row_tile=64,
    )
    jax.block_until_ready((x_out, out_idx, out_val))

    # quick sanity check against plain-JAX reference
    ref_x = x + rrwp @ w_node
    flat = edge_index[0] * N + edge_index[1]
    cnt = jnp.zeros((N * N,), jnp.float32).at[flat].add(1.0)[:, None]
    ref_val = rrwp_val @ w_edge + cnt * dummy_emb
    assert jnp.allclose(x_out, ref_x, atol=1e-5)
    assert jnp.allclose(out_val, ref_val, atol=1e-5)
    assert out_idx.shape == (2, N * N)

    print("KERNEL_OK")
</pallas_src>

<mosaic_0001>
module attributes {stable_mosaic.version = 11 : i64} {
  func.func @_node_kernel(%arg0: i32, %arg1: memref<16x128xf32, #tpu.memory_space<vmem>>, %arg2: memref<16x8xf32, #tpu.memory_space<vmem>>, %arg3: memref<8x128xf32, #tpu.memory_space<vmem>>, %arg4: memref<16x128xf32, #tpu.memory_space<vmem>>) attributes {dimension_semantics = [#tpu.dimension_semantics<parallel>], iteration_bounds = array<i64: 1>, scalar_prefetch = 0 : i64, scratch_operands = 0 : i64, tpu.core_type = #tpu.core_type<tc>, window_params = [{transform_indices = @transform_0, window_bounds = array<i64: 16, 128>}, {transform_indices = @transform_1, window_bounds = array<i64: 16, 8>}, {pipeline_mode = #tpu.pipeline_mode<synchronous>, transform_indices = @transform_2, window_bounds = array<i64: 8, 128>}, {transform_indices = @transform_3, window_bounds = array<i64: 16, 128>}]} {
    %c0 = arith.constant 0 : index
    %c0_0 = arith.constant 0 : index
    %0 = vector.load %arg1[%c0, %c0_0] : memref<16x128xf32, #tpu.memory_space<vmem>>, vector<16x128xf32>
    %c0_1 = arith.constant 0 : index
    %c0_2 = arith.constant 0 : index
    %1 = vector.load %arg2[%c0_1, %c0_2] : memref<16x8xf32, #tpu.memory_space<vmem>>, vector<16x8xf32>
    %c0_3 = arith.constant 0 : index
    %c0_4 = arith.constant 0 : index
    %2 = vector.load %arg3[%c0_3, %c0_4] : memref<8x128xf32, #tpu.memory_space<vmem>>, vector<8x128xf32>
    %cst = arith.constant dense<0.000000e+00> : vector<16x128xf32>
    %3 = tpu.matmul %1, %2, %cst {dimension_numbers = #tpu.dot_dimension_numbers<[1], [0], [0], [1], [0, 0, 1, 1], [], []>} : vector<16x8xf32>, vector<8x128xf32>, vector<16x128xf32> -> vector<16x128xf32>
    %4 = arith.addf %0, %3 : vector<16x128xf32>
    %c0_5 = arith.constant 0 : index
    %c0_6 = arith.constant 0 : index
    %5 = vector.load %arg4[%c0_5, %c0_6] : memref<16x128xf32, #tpu.memory_space<vmem>>, vector<16x128xf32>
    tpu.vector_store %arg4[%c0_5, %c0_6], %4 {strides = array<i32>} : memref<16x128xf32, #tpu.memory_space<vmem>>, vector<16x128xf32>,
    return
  }
  func.func @transform_0(%arg0: i32) -> (i32, i32) {
    %c0_i32 = arith.constant 0 : i32
    %c0_i32_0 = arith.constant 0 : i32
    return %arg0, %c0_i32 : i32, i32
  }
  func.func @transform_1(%arg0: i32) -> (i32, i32) {
    %c0_i32 = arith.constant 0 : i32
    %c0_i32_0 = arith.constant 0 : i32
    return %arg0, %c0_i32 : i32, i32
  }
  func.func @transform_2(%arg0: i32) -> (i32, i32) {
    %c0_i32 = arith.constant 0 : i32
    %c0_i32_0 = arith.constant 0 : i32
    %c0_i32_1 = arith.constant 0 : i32
    return %c0_i32, %c0_i32_0 : i32, i32
  }
  func.func @transform_3(%arg0: i32) -> (i32, i32) {
    %c0_i32 = arith.constant 0 : i32
    %c0_i32_0 = arith.constant 0 : i32
    return %arg0, %c0_i32 : i32, i32
  }
}

</mosaic_0001>

<bundles_post_ra>
// kernel: tpu_custom_call.1
= control target key start
LH: loop header
LB: loop body
LE: loop exit
PB: predicated region body
PF: predicated region fallthrough
CT: control target
= control target key end

     0   :  { %8 = vsyncpa [#allocation3], 0  ;;  %s363_s0 = inlined_call_operand.hbm [shape: f32[16,128], index: 0, kind: input, shape index: {}]   ;;  %s364_s1 = inlined_call_operand.hbm [shape: f32[16,8], index: 1, kind: input, shape index: {}]   ;;  %s365_s2 = inlined_call_operand.hbm [shape: f32[8,128], index: 2, kind: input, shape index: {}]   ;;  %s366_s3 = inlined_call_operand.hbm [shape: f32[16,128], index: 3, kind: output, shape index: {}]  }
   0x1   :  { %9 = vsyncpa [#allocation6], 0 }
   0x2   :  { %10 = vsyncpa [#allocation4], 0  ;;  %s273_s12 = smov [#allocation5]   ;;  %s274_s14 = smov [#allocation2]  }
   0x3   :  { %s28_s13 = sshll.u32 %s273_s12, 4  ;;  %s16_s15 = sshll.u32 %s274_s14, 4  ;;  %s29_s13 = int_to_ptr.vmem [resolvable:$true] %s28_s13  ;;  %s299_s15 = int_to_ptr.vmem [resolvable:$true] %s16_s15 }
   0x4   :  { %s179_s18 = scalar_lea.hbm %s364_s1, 256 }
   0x5   :  { %p180_p0 = scmp.ne.s32.totalorder %s364_s1, %s179_s18  ;;  %p183_p1 = scmp.lt.u32.totalorder %s179_s18, %s364_s1 }
   0x7   :  { %p185_p2 = pnand %p183_p1, %p180_p0 }
   0x9   :  { %188 = shalt.err (!%p185_p2)
}
   0xa   :  { %s189_s23 = scalar_lea.vmem %s29_s13, 256  ;;  %p194_p4 = scmp.lt.s32.totalorder %s29_s13, %s29_s13 }
   0xb   :  { %p190_p3 = scmp.ne.s32.totalorder %s29_s13, %s189_s23  ;;  %p195_p5 = scmp.lt.s32.totalorder %s189_s23, %s189_s23 }
   0xd   :  { %p196_p6 = por %p195_p5, %p194_p4 }
   0xf   :  { %p197_p7 = pnand %p196_p6, %p190_p3 }
  0x11   :  { %200 = shalt.err (!%p197_p7)
}
  0x12   :  { %s275_s24 = smov 128   ;;  %s276_s25 = smov 8  }
  0x13   :  { %34 = dma.hbm_to_vmem [thread:$0]  %s364_s1, 256, %s29_s13, [#allocation6], %s275_s24, %s275_s24, %s276_s25  }
  0x14   :  { %s201_s30 = scalar_lea.hbm %s363_s0, 256 }
  0x15   :  { %p202_p8 = scmp.ne.s32.totalorder %s363_s0, %s201_s30  ;;  %p205_p9 = scmp.lt.u32.totalorder %s201_s30, %s363_s0 }
  0x17   :  { %p207_p10 = pnand %p205_p9, %p202_p8 }
  0x19   :  { %210 = shalt.err (!%p207_p10)
}
  0x1a   :  { %s211_s8 = scalar_lea.vmem %s299_s15, 256  ;;  %p216_p12 = scmp.lt.s32.totalorder %s299_s15, %s299_s15 }
  0x1b   :  { %p212_p11 = scmp.ne.s32.totalorder %s299_s15, %s211_s8  ;;  %p217_p13 = scmp.lt.s32.totalorder %s211_s8, %s211_s8 }
  0x1d   :  { %p218_p0 = por %p217_p13, %p216_p12 }
  0x1f   :  { %p219_p1 = pnand %p218_p0, %p212_p11 }
  0x21   :  { %222 = shalt.err (!%p219_p1)
}
  0x22   :  { %22 = dma.hbm_to_vmem [thread:$0]  %s363_s0, 256, %s299_s15, [#allocation3], %s275_s24, %s275_s24, %s276_s25  }
  0x23   :  { %s277_s10 = smov [#allocation7]   ;;  %s223_s14 = scalar_lea.hbm %s365_s2, 128 }
  0x24   :  { %s41_s11 = sshll.u32 %s277_s10, 4  ;;  %p224_p2 = scmp.ne.s32.totalorder %s365_s2, %s223_s14  ;;  %s42_s11 = int_to_ptr.vmem [resolvable:$true] %s41_s11 }
  0x25   :  { %p227_p3 = scmp.lt.u32.totalorder %s223_s14, %s365_s2 }
  0x27   :  { %p229_p4 = pnand %p227_p3, %p224_p2 }
  0x29   :  { %232 = shalt.err (!%p229_p4)
}
  0x2a   :  { %s233_s20 = scalar_lea.vmem %s42_s11, 128  ;;  %p238_p6 = scmp.lt.s32.totalorder %s42_s11, %s42_s11 }
  0x2b   :  { %p234_p5 = scmp.ne.s32.totalorder %s42_s11, %s233_s20  ;;  %p239_p7 = scmp.lt.s32.totalorder %s233_s20, %s233_s20 }
  0x2d   :  { %p240_p8 = por %p239_p7, %p238_p6 }
  0x2f   :  { %p241_p9 = pnand %p240_p8, %p234_p5 }
  0x31   :  { %244 = shalt.err (!%p241_p9)
}
  0x32   :  { %44 = dma.hbm_to_vmem [thread:$0]  %s365_s2, 128, %s42_s11, [#allocation6]  }
  0x33   :  { %267 = dma.done.wait [#allocation3], 256  }
  0x34   :  { %268 = vsyncadd [#allocation3], 4294967040 }
  0x35   :  { %269 = dma.done.wait [#allocation6], 384  }
  0x36   :  { %270 = vsyncadd [#allocation6], 4294966912  ;;  %vm59_vm0 = vcmask 64512   ;;  %v58_v0 = vld [vmem:[#allocation7] sm:$0xff]  ;;  %v56_v1 = vld [vmem:[#allocation5] sm:$0xff]  ;;  %s278_s21 = smov [#allocation8]  }
  0x37   :  { %v57_v2 = vld [vmem:[#allocation5 + $0x8] sm:$0xff]  ;;  %168 = vmatprep.subr.mxu0 %v58_v0  ;;  %170 = vmatprep.mubr.msk.f32.mxu0 %vm59_vm0, %v56_v1  ;;  %v55_v3 = vld [vmem:[#allocation2 + $0x8] sm:$0xff]  ;;  %v54_v4 = vld [vmem:[#allocation2] sm:$0xff]  ;;  %s150_s22 = sshll.u32 %s278_s21, 4  ;;  %s151_s22 = int_to_ptr.vmem [resolvable:$true] %s150_s22 }
  0x38   :  { %169 = vmatpush3.msra.mxu0 %v58_v0  ;;  %s245_s2 = scalar_lea.vmem %s151_s22, 256  ;;  %p250_p11 = scmp.lt.s32.totalorder %s151_s22, %s151_s22 }
  0x39   :  { %171 = vmatmul.mubr.msk.f32.vlgmr.msra.gmra.mrb[0].mxu0 %vm59_vm0, %v57_v2  ;;  %p246_p10 = scmp.ne.s32.totalorder %s151_s22, %s245_s2  ;;  %p251_p12 = scmp.lt.s32.totalorder %s245_s2, %s245_s2 }
  0x3b   :  { %p252_p13 = por %p251_p12, %p250_p11 }
  0x3d   :  { %p253_p0 = pnand %p252_p13, %p246_p10 }
 0x10c   :  { %v172_v5 = vpop.f32.mrb[0].mxu0 }
 0x10d   :  { %v142_v6 = vadd.f32 %v172_v5, %v55_v3  ;;  %v132_v7 = vpop.f32.mrb[1].mxu0 }
 0x10e   :  { %v141_v8 = vadd.f32 %v132_v7, %v54_v4 }
 0x10f   :  { %144 = vst [vmem:[#allocation8 + $0x8] sm:$0xff] %v142_v6 }
 0x110   :  { %143 = vst [vmem:[#allocation8] sm:$0xff] %v141_v8 }
 0x111   :  { %256 = shalt.err (!%p253_p0)
}
 0x112   :  { %s257_s27 = scalar_lea.hbm %s366_s3, 256 }
 0x113   :  { %p258_p1 = scmp.ne.s32.totalorder %s366_s3, %s257_s27  ;;  %p261_p2 = scmp.lt.u32.totalorder %s257_s27, %s366_s3 }
 0x115   :  { %p263_p3 = pnand %p261_p2, %p258_p1 }
 0x117   :  { %266 = shalt.err (!%p263_p3)
}
 0x118   :  { %156 = dma.vmem_to_hbm [thread:$0]  %s151_s22, 256, %s366_s3, [#allocation4], %s275_s24, %s275_s24, %s276_s25  }
 0x119   :  { %271 = dma.done.wait [#allocation4], 256  }
 0x11a   :  { %272 = vsyncadd [#allocation4], 4294967040 }
 0x11b   :  { %160 = vsyncpa [#allocation3], 1 }
 0x11c   :  { %161 = vsyncpa [#allocation6], 1 }
 0x11d   :  { %162 = vsyncpa [#allocation4], 1 }

</bundles_post_ra>
